<compile_context>
chip_gen: v7x
topology: tpu7x:2x2x1
jax: 0.10.0
libtpu: 0.0.40
codegen_flags: <defaults>
</compile_context>

<pallas_src>
import jax
import jax.numpy as jnp
from jax.experimental import pallas as pl
from jax.experimental.pallas import tpu as pltpu

HID1, HID2 = 64, 256      # fixed hidden widths of the module
LANE = 128                # TPU lane width
SUB = 8                   # sublane granularity


def _round_up(n, m):
    return ((n + m - 1) // m) * m


# -----------------------------------------------------------------------------
# Kernel
# -----------------------------------------------------------------------------
def s2s_kernel(x_ref, w1_ref, b1_ref, w2_ref, b2_ref, w3_ref, b3_ref, o_ref):
    # x arrives as f32; cast to the bf16 compute dtype in-kernel (fused with load).
    x = x_ref[...].astype(w1_ref.dtype)                                # (TB, d2)
    # Linear(d2 -> 128[=padded 64]) + ReLU  (bf16 operands, f32 accumulate)
    h1 = jnp.dot(x, w1_ref[...], preferred_element_type=jnp.float32) + b1_ref[...]
    h1 = jnp.maximum(h1, 0.0).astype(w2_ref.dtype)                     # lane-dense
    # Linear(128 -> 256) + ReLU
    h2 = jnp.dot(h1, w2_ref[...], preferred_element_type=jnp.float32) + b2_ref[...]
    h2 = jnp.maximum(h2, 0.0).astype(w3_ref.dtype)
    # Linear(256 -> d1)  (d1 unpadded: full-array last dim, minimal HBM writeback)
    o_ref[...] = (jnp.dot(h2, w3_ref[...], preferred_element_type=jnp.float32)
                  + b3_ref[...]).astype(o_ref.dtype)


# -----------------------------------------------------------------------------
# One-time parameter preparation (hoisted out of the per-call path)
# -----------------------------------------------------------------------------
def prepare_params(params, compute_dtype=jnp.bfloat16):
    """Transpose torch-layout (out, in) weights to (in, out), cast matmul operands
    to `compute_dtype`, and pad hidden-1 (64) up to 128 lanes with zeros."""
    d2 = params["w1"].shape[1]
    d1 = params["w3"].shape[0]
    h1p = _round_up(HID1, LANE)                                        # 128

    w1 = jnp.zeros((d2, h1p), compute_dtype).at[:, :HID1].set(
        params["w1"].T.astype(compute_dtype))                          # (d2, 128)
    b1 = jnp.zeros((1, h1p), jnp.float32).at[:, :HID1].set(
        params["b1"].reshape(1, -1).astype(jnp.float32))               # (1, 128)
    w2 = jnp.zeros((h1p, HID2), compute_dtype).at[:HID1, :].set(
        params["w2"].T.astype(compute_dtype))                          # (128, 256)
    b2 = params["b2"].reshape(1, -1).astype(jnp.float32)               # (1, 256)
    w3 = params["w3"].T.astype(compute_dtype)                          # (256, d1)
    b3 = params["b3"].reshape(1, -1).astype(jnp.float32)               # (1, d1)

    return {"w1": w1, "b1": b1, "w2": w2, "b2": b2, "w3": w3, "b3": b3,
            "d1": d1, "d2": d2, "h1p": h1p}


# -----------------------------------------------------------------------------
# Forward wrapper
# -----------------------------------------------------------------------------
def s2s_forward(x, prep, *, tb=1024):
    """x: (B, state_dim2) float32. prep: output of prepare_params()."""
    B, d2 = x.shape
    d1, h1p = prep["d1"], prep["h1p"]

    # Batch tile: sublane-aligned. If B exceeds the tile, cap the tile so the grid
    # has >= 2 steps (both v7x TensorCores get work under "parallel").
    tb = max(SUB, _round_up(tb, SUB))
    if B <= tb:
        tb_eff = _round_up(B, SUB)
    else:
        half = _round_up(-(-B // 2), SUB)
        tb_eff = min(tb, half)
    Bp = _round_up(B, tb_eff)

    # Input stays f32; only zero-pad the batch when it isn't tile-aligned.
    xp = x if Bp == B else jnp.zeros((Bp, d2), x.dtype).at[:B].set(x)

    w1, b1, w2, b2, w3, b3 = (prep[k] for k in ("w1", "b1", "w2", "b2", "w3", "b3"))

    cost = pl.CostEstimate(
        flops=2 * Bp * (d2 * h1p + h1p * HID2 + HID2 * d1),
        transcendentals=0,
        bytes_accessed=(xp.size * xp.dtype.itemsize
                        + sum(a.size * a.dtype.itemsize
                              for a in (w1, b1, w2, b2, w3, b3))
                        + Bp * d1 * 4),
    )

    def _run(weight_pipeline_mode):
        # Weights/biases: constant block index -> loaded once, VMEM-resident.
        def resident(shape):
            if weight_pipeline_mode is not None:
                return pl.BlockSpec(shape, lambda i: (0, 0),
                                    pipeline_mode=weight_pipeline_mode)
            return pl.BlockSpec(shape, lambda i: (0, 0))

        return pl.pallas_call(
            s2s_kernel,
            out_shape=jax.ShapeDtypeStruct((Bp, d1), jnp.float32),
            grid=(Bp // tb_eff,),
            in_specs=[
                pl.BlockSpec((tb_eff, d2), lambda i: (i, 0)),   # x: tiled over batch
                resident(w1.shape), resident(b1.shape),
                resident(w2.shape), resident(b2.shape),
                resident(w3.shape), resident(b3.shape),
            ],
            out_specs=pl.BlockSpec((tb_eff, d1), lambda i: (i, 0)),
            compiler_params=pltpu.CompilerParams(
                dimension_semantics=("parallel",),   # shards steps across v7x's 2 TCs
            ),
            cost_estimate=cost,
        )(xp, w1, b1, w2, b2, w3, b3)

    buffered = getattr(pl, "Buffered", None)
    if buffered is not None:
        try:
            out = _run(buffered(1))      # single-buffer the resident weights/biases
        except Exception:                # API/lowering mismatch -> default buffering
            out = _run(None)
    else:
        out = _run(None)

    return out if Bp == B else out[:B]


# -----------------------------------------------------------------------------
# Init + reference (for verification)
# -----------------------------------------------------------------------------
def init_params(key, state_dim1, state_dim2):
    """Deterministic init mimicking torch.nn.Linear (uniform +/- 1/sqrt(fan_in))."""
    ks = jax.random.split(key, 6)

    def linear(kw, kb, fan_in, fan_out):
        bound = 1.0 / jnp.sqrt(fan_in)
        w = jax.random.uniform(kw, (fan_out, fan_in), jnp.float32, -bound, bound)
        b = jax.random.uniform(kb, (fan_out,), jnp.float32, -bound, bound)
        return w, b

    w1, b1 = linear(ks[0], ks[1], state_dim2, HID1)
    w2, b2 = linear(ks[2], ks[3], HID1, HID2)
    w3, b3 = linear(ks[4], ks[5], HID2, state_dim1)
    return {"w1": w1, "b1": b1, "w2": w2, "b2": b2, "w3": w3, "b3": b3}


def s2s_reference(x, p):
    h1 = jnp.maximum(x @ p["w1"].T + p["b1"], 0.0)
    h2 = jnp.maximum(h1 @ p["w2"].T + p["b2"], 0.0)
    return h2 @ p["w3"].T + p["b3"]


if __name__ == "__main__":
    key = jax.random.PRNGKey(0)
    k_param, k_x1, k_x2, k_x3 = jax.random.split(key, 4)

    # Small shapes consistent with the module: state is (batch, state_dim2).
    batch, state_dim1, state_dim2 = 8, 16, 32
    params = init_params(k_param, state_dim1, state_dim2)
    prep = prepare_params(params)            # one-time glue, hoisted out of forward

    # Test 1: tiny batch (single grid step).
    x = jax.random.normal(k_x1, (batch, state_dim2), jnp.float32)
    out = jax.block_until_ready(s2s_forward(x, prep))
    ref = s2s_reference(x, params)
    assert out.shape == (batch, state_dim1)
    assert jnp.allclose(out, ref, atol=5e-2, rtol=5e-2), "mismatch vs reference (B=8)"

    # Test 2: non-multiple-of-8 batch exercises the padding path.
    x2 = jax.random.normal(k_x2, (37, state_dim2), jnp.float32)
    out2 = jax.block_until_ready(s2s_forward(x2, prep))
    ref2 = s2s_reference(x2, params)
    assert out2.shape == (37, state_dim1)
    assert jnp.allclose(out2, ref2, atol=5e-2, rtol=5e-2), "mismatch vs reference (B=37)"

    # Test 3: multi-step grid (tiled batch + pad) path at a still-small size.
    x3 = jax.random.normal(k_x3, (300, state_dim2), jnp.float32)
    out3 = jax.block_until_ready(s2s_forward(x3, prep, tb=128))
    ref3 = s2s_reference(x3, params)
    assert out3.shape == (300, state_dim1)
    assert jnp.allclose(out3, ref3, atol=5e-2, rtol=5e-2), "mismatch vs reference (B=300)"

    print("KERNEL_OK")
</pallas_src>

<mosaic_0001>
module attributes {stable_mosaic.version = 11 : i64} {
  func.func @s2s_kernel(%arg0: i32, %arg1: memref<8x32xf32, #tpu.memory_space<vmem>>, %arg2: memref<32x128xbf16, #tpu.memory_space<vmem>>, %arg3: memref<1x128xf32, #tpu.memory_space<vmem>>, %arg4: memref<128x256xbf16, #tpu.memory_space<vmem>>, %arg5: memref<1x256xf32, #tpu.memory_space<vmem>>, %arg6: memref<256x16xbf16, #tpu.memory_space<vmem>>, %arg7: memref<1x16xf32, #tpu.memory_space<vmem>>, %arg8: memref<8x16xf32, #tpu.memory_space<vmem>>) attributes {dimension_semantics = [#tpu.dimension_semantics<parallel>], iteration_bounds = array<i64: 1>, scalar_prefetch = 0 : i64, scratch_operands = 0 : i64, tpu.core_type = #tpu.core_type<tc>, window_params = [{transform_indices = @transform_0, window_bounds = array<i64: 8, 32>}, {pipeline_mode = #tpu.pipeline_mode<synchronous>, transform_indices = @transform_1, window_bounds = array<i64: 32, 128>}, {pipeline_mode = #tpu.pipeline_mode<synchronous>, transform_indices = @transform_2, window_bounds = array<i64: 1, 128>}, {pipeline_mode = #tpu.pipeline_mode<synchronous>, transform_indices = @transform_3, window_bounds = array<i64: 128, 256>}, {pipeline_mode = #tpu.pipeline_mode<synchronous>, transform_indices = @transform_4, window_bounds = array<i64: 1, 256>}, {pipeline_mode = #tpu.pipeline_mode<synchronous>, transform_indices = @transform_5, window_bounds = array<i64: 256, 16>}, {pipeline_mode = #tpu.pipeline_mode<synchronous>, transform_indices = @transform_6, window_bounds = array<i64: 1, 16>}, {transform_indices = @transform_7, window_bounds = array<i64: 8, 16>}]} {
    %c0 = arith.constant 0 : index
    %c0_0 = arith.constant 0 : index
    %0 = vector.load %arg1[%c0, %c0_0] : memref<8x32xf32, #tpu.memory_space<vmem>>, vector<8x32xf32>
    %1 = arith.truncf %0 : vector<8x32xf32> to vector<8x32xbf16>
    %c0_1 = arith.constant 0 : index
    %c0_2 = arith.constant 0 : index
    %2 = vector.load %arg2[%c0_1, %c0_2] : memref<32x128xbf16, #tpu.memory_space<vmem>>, vector<32x128xbf16>
    %cst = arith.constant dense<0.000000e+00> : vector<8x128xf32>
    %3 = tpu.matmul %1, %2, %cst {dimension_numbers = #tpu.dot_dimension_numbers<[1], [0], [0], [1], [0, 0, 1, 1], [], []>} : vector<8x32xbf16>, vector<32x128xbf16>, vector<8x128xf32> -> vector<8x128xf32>
    %c0_3 = arith.constant 0 : index
    %c0_4 = arith.constant 0 : index
    %4 = vector.load %arg3[%c0_3, %c0_4] : memref<1x128xf32, #tpu.memory_space<vmem>>, vector<1x128xf32>
    %5 = vector.broadcast %4 : vector<1x128xf32> to vector<8x128xf32>
    %6 = arith.addf %3, %5 : vector<8x128xf32>
    %cst_5 = arith.constant 0.000000e+00 : f32
    %7 = vector.broadcast %cst_5 : f32 to vector<8x128xf32>
    %8 = arith.maximumf %6, %7 : vector<8x128xf32>
    %9 = arith.truncf %8 : vector<8x128xf32> to vector<8x128xbf16>
    %c0_6 = arith.constant 0 : index
    %c0_7 = arith.constant 0 : index
    %10 = vector.load %arg4[%c0_6, %c0_7] : memref<128x256xbf16, #tpu.memory_space<vmem>>, vector<128x256xbf16>
    %cst_8 = arith.constant dense<0.000000e+00> : vector<8x256xf32>
    %11 = tpu.matmul %9, %10, %cst_8 {dimension_numbers = #tpu.dot_dimension_numbers<[1], [0], [0], [1], [0, 0, 1, 1], [], []>} : vector<8x128xbf16>, vector<128x256xbf16>, vector<8x256xf32> -> vector<8x256xf32>
    %c0_9 = arith.constant 0 : index
    %c0_10 = arith.constant 0 : index
    %12 = vector.load %arg5[%c0_9, %c0_10] : memref<1x256xf32, #tpu.memory_space<vmem>>, vector<1x256xf32>
    %13 = vector.broadcast %12 : vector<1x256xf32> to vector<8x256xf32>
    %14 = arith.addf %11, %13 : vector<8x256xf32>
    %cst_11 = arith.constant 0.000000e+00 : f32
    %15 = vector.broadcast %cst_11 : f32 to vector<8x256xf32>
    %16 = arith.maximumf %14, %15 : vector<8x256xf32>
    %17 = arith.truncf %16 : vector<8x256xf32> to vector<8x256xbf16>
    %c0_12 = arith.constant 0 : index
    %c0_13 = arith.constant 0 : index
    %18 = vector.load %arg6[%c0_12, %c0_13] : memref<256x16xbf16, #tpu.memory_space<vmem>>, vector<256x16xbf16>
    %cst_14 = arith.constant dense<0.000000e+00> : vector<8x16xf32>
    %19 = tpu.matmul %17, %18, %cst_14 {dimension_numbers = #tpu.dot_dimension_numbers<[1], [0], [0], [1], [0, 0, 1, 1], [], []>} : vector<8x256xbf16>, vector<256x16xbf16>, vector<8x16xf32> -> vector<8x16xf32>
    %c0_15 = arith.constant 0 : index
    %c0_16 = arith.constant 0 : index
    %20 = vector.load %arg7[%c0_15, %c0_16] : memref<1x16xf32, #tpu.memory_space<vmem>>, vector<1x16xf32>
    %21 = vector.broadcast %20 : vector<1x16xf32> to vector<8x16xf32>
    %22 = arith.addf %19, %21 : vector<8x16xf32>
    %c0_17 = arith.constant 0 : index
    %c0_18 = arith.constant 0 : index
    %23 = vector.load %arg8[%c0_17, %c0_18] : memref<8x16xf32, #tpu.memory_space<vmem>>, vector<8x16xf32>
    tpu.vector_store %arg8[%c0_17, %c0_18], %22 {strides = array<i32>} : memref<8x16xf32, #tpu.memory_space<vmem>>, vector<8x16xf32>,
    return
  }
  func.func @transform_0(%arg0: i32) -> (i32, i32) {
    %c0_i32 = arith.constant 0 : i32
    %c0_i32_0 = arith.constant 0 : i32
    return %arg0, %c0_i32 : i32, i32
  }
  func.func @transform_1(%arg0: i32) -> (i32, i32) {
    %c0_i32 = arith.constant 0 : i32
    %c0_i32_0 = arith.constant 0 : i32
    %c0_i32_1 = arith.constant 0 : i32
    return %c0_i32, %c0_i32_0 : i32, i32
  }
  func.func @transform_2(%arg0: i32) -> (i32, i32) {
    %c0_i32 = arith.constant 0 : i32
    %c0_i32_0 = arith.constant 0 : i32
    %c0_i32_1 = arith.constant 0 : i32
    return %c0_i32, %c0_i32_0 : i32, i32
  }
  func.func @transform_3(%arg0: i32) -> (i32, i32) {
    %c0_i32 = arith.constant 0 : i32
    %c0_i32_0 = arith.constant 0 : i32
    %c0_i32_1 = arith.constant 0 : i32
    return %c0_i32, %c0_i32_0 : i32, i32
  }
  func.func @transform_4(%arg0: i32) -> (i32, i32) {
    %c0_i32 = arith.constant 0 : i32
    %c0_i32_0 = arith.constant 0 : i32
    %c0_i32_1 = arith.constant 0 : i32
    return %c0_i32, %c0_i32_0 : i32, i32
  }
  func.func @transform_5(%arg0: i32) -> (i32, i32) {
    %c0_i32 = arith.constant 0 : i32
    %c0_i32_0 = arith.constant 0 : i32
    %c0_i32_1 = arith.constant 0 : i32
    return %c0_i32, %c0_i32_0 : i32, i32
  }
  func.func @transform_6(%arg0: i32) -> (i32, i32) {
    %c0_i32 = arith.constant 0 : i32
    %c0_i32_0 = arith.constant 0 : i32
    %c0_i32_1 = arith.constant 0 : i32
    return %c0_i32, %c0_i32_0 : i32, i32
  }
  func.func @transform_7(%arg0: i32) -> (i32, i32) {
    %c0_i32 = arith.constant 0 : i32
    %c0_i32_0 = arith.constant 0 : i32
    return %arg0, %c0_i32 : i32, i32
  }
}

module attributes {stable_mosaic.version = 11 : i64} {
  func.func @s2s_kernel(%arg0: i32, %arg1: memref<8x32xf32, #tpu.memory_space<vmem>>, %arg2: memref<32x128xbf16, #tpu.memory_space<vmem>>, %arg3: memref<1x128xf32, #tpu.memory_space<vmem>>, %arg4: memref<128x256xbf16, #tpu.memory_space<vmem>>, %arg5: memref<1x256xf32, #tpu.memory_space<vmem>>, %arg6: memref<256x16xbf16, #tpu.memory_space<vmem>>, %arg7: memref<1x16xf32, #tpu.memory_space<vmem>>, %arg8: memref<8x16xf32, #tpu.memory_space<vmem>>) attributes {dimension_semantics = [#tpu.dimension_semantics<parallel>], iteration_bounds = array<i64: 1>, scalar_prefetch = 0 : i64, scratch_operands = 0 : i64, tpu.core_type = #tpu.core_type<tc>, window_params = [{transform_indices = @transform_0, window_bounds = array<i64: 8, 32>}, {pipeline_mode = #tpu.pipeline_mode<synchronous>, transform_indices = @transform_1, window_bounds = array<i64: 32, 128>}, {pipeline_mode = #tpu.pipeline_mode<synchronous>, transform_indices = @transform_2, window_bounds = array<i64: 1, 128>}, {pipeline_mode = #tpu.pipeline_mode<synchronous>, transform_indices = @transform_3, window_bounds = array<i64: 128, 256>}, {pipeline_mode = #tpu.pipeline_mode<synchronous>, transform_indices = @transform_4, window_bounds = array<i64: 1, 256>}, {pipeline_mode = #tpu.pipeline_mode<synchronous>, transform_indices = @transform_5, window_bounds = array<i64: 256, 16>}, {pipeline_mode = #tpu.pipeline_mode<synchronous>, transform_indices = @transform_6, window_bounds = array<i64: 1, 16>}, {transform_indices = @transform_7, window_bounds = array<i64: 8, 16>}]} {
    %c0 = arith.constant 0 : index
    %c0_0 = arith.constant 0 : index
    %0 = vector.load %arg1[%c0, %c0_0] : memref<8x32xf32, #tpu.memory_space<vmem>>, vector<8x32xf32>
    %1 = arith.truncf %0 : vector<8x32xf32> to vector<8x32xbf16>
    %c0_1 = arith.constant 0 : index
    %c0_2 = arith.constant 0 : index
    %2 = vector.load %arg2[%c0_1, %c0_2] : memref<32x128xbf16, #tpu.memory_space<vmem>>, vector<32x128xbf16>
    %cst = arith.constant dense<0.000000e+00> : vector<8x128xf32>
    %3 = tpu.matmul %1, %2, %cst {dimension_numbers = #tpu.dot_dimension_numbers<[1], [0], [0], [1], [0, 0, 1, 1], [], []>} : vector<8x32xbf16>, vector<32x128xbf16>, vector<8x128xf32> -> vector<8x128xf32>
    %c0_3 = arith.constant 0 : index
    %c0_4 = arith.constant 0 : index
    %4 = vector.load %arg3[%c0_3, %c0_4] : memref<1x128xf32, #tpu.memory_space<vmem>>, vector<1x128xf32>
    %5 = vector.broadcast %4 : vector<1x128xf32> to vector<8x128xf32>
    %6 = arith.addf %3, %5 : vector<8x128xf32>
    %cst_5 = arith.constant 0.000000e+00 : f32
    %7 = vector.broadcast %cst_5 : f32 to vector<8x128xf32>
    %8 = arith.maximumf %6, %7 : vector<8x128xf32>
    %9 = arith.truncf %8 : vector<8x128xf32> to vector<8x128xbf16>
    %c0_6 = arith.constant 0 : index
    %c0_7 = arith.constant 0 : index
    %10 = vector.load %arg4[%c0_6, %c0_7] : memref<128x256xbf16, #tpu.memory_space<vmem>>, vector<128x256xbf16>
    %cst_8 = arith.constant dense<0.000000e+00> : vector<8x256xf32>
    %11 = tpu.matmul %9, %10, %cst_8 {dimension_numbers = #tpu.dot_dimension_numbers<[1], [0], [0], [1], [0, 0, 1, 1], [], []>} : vector<8x128xbf16>, vector<128x256xbf16>, vector<8x256xf32> -> vector<8x256xf32>
    %c0_9 = arith.constant 0 : index
    %c0_10 = arith.constant 0 : index
    %12 = vector.load %arg5[%c0_9, %c0_10] : memref<1x256xf32, #tpu.memory_space<vmem>>, vector<1x256xf32>
    %13 = vector.broadcast %12 : vector<1x256xf32> to vector<8x256xf32>
    %14 = arith.addf %11, %13 : vector<8x256xf32>
    %cst_11 = arith.constant 0.000000e+00 : f32
    %15 = vector.broadcast %cst_11 : f32 to vector<8x256xf32>
    %16 = arith.maximumf %14, %15 : vector<8x256xf32>
    %17 = arith.truncf %16 : vector<8x256xf32> to vector<8x256xbf16>
    %c0_12 = arith.constant 0 : index
    %c0_13 = arith.constant 0 : index
    %18 = vector.load %arg6[%c0_12, %c0_13] : memref<256x16xbf16, #tpu.memory_space<vmem>>, vector<256x16xbf16>
    %cst_14 = arith.constant dense<0.000000e+00> : vector<8x16xf32>
    %19 = tpu.matmul %17, %18, %cst_14 {dimension_numbers = #tpu.dot_dimension_numbers<[1], [0], [0], [1], [0, 0, 1, 1], [], []>} : vector<8x256xbf16>, vector<256x16xbf16>, vector<8x16xf32> -> vector<8x16xf32>
    %c0_15 = arith.constant 0 : index
    %c0_16 = arith.constant 0 : index
    %20 = vector.load %arg7[%c0_15, %c0_16] : memref<1x16xf32, #tpu.memory_space<vmem>>, vector<1x16xf32>
    %21 = vector.broadcast %20 : vector<1x16xf32> to vector<8x16xf32>
    %22 = arith.addf %19, %21 : vector<8x16xf32>
    %c0_17 = arith.constant 0 : index
    %c0_18 = arith.constant 0 : index
    %23 = vector.load %arg8[%c0_17, %c0_18] : memref<8x16xf32, #tpu.memory_space<vmem>>, vector<8x16xf32>
    tpu.vector_store %arg8[%c0_17, %c0_18], %22 {strides = array<i32>} : memref<8x16xf32, #tpu.memory_space<vmem>>, vector<8x16xf32>,
    return
  }
  func.func @transform_0(%arg0: i32) -> (i32, i32) {
    %c0_i32 = arith.constant 0 : i32
    %c0_i32_0 = arith.constant 0 : i32
    return %arg0, %c0_i32 : i32, i32
  }
  func.func @transform_1(%arg0: i32) -> (i32, i32) {
    %c0_i32 = arith.constant 0 : i32
    %c0_i32_0 = arith.constant 0 : i32
    %c0_i32_1 = arith.constant 0 : i32
    return %c0_i32, %c0_i32_0 : i32, i32
  }
  func.func @transform_2(%arg0: i32) -> (i32, i32) {
    %c0_i32 = arith.constant 0 : i32
    %c0_i32_0 = arith.constant 0 : i32
    %c0_i32_1 = arith.constant 0 : i32
    return %c0_i32, %c0_i32_0 : i32, i32
  }
  func.func @transform_3(%arg0: i32) -> (i32, i32) {
    %c0_i32 = arith.constant 0 : i32
    %c0_i32_0 = arith.constant 0 : i32
    %c0_i32_1 = arith.constant 0 : i32
    return %c0_i32, %c0_i32_0 : i32, i32
  }
  func.func @transform_4(%arg0: i32) -> (i32, i32) {
    %c0_i32 = arith.constant 0 : i32
    %c0_i32_0 = arith.constant 0 : i32
    %c0_i32_1 = arith.constant 0 : i32
    return %c0_i32, %c0_i32_0 : i32, i32
  }
  func.func @transform_5(%arg0: i32) -> (i32, i32) {
    %c0_i32 = arith.constant 0 : i32
    %c0_i32_0 = arith.constant 0 : i32
    %c0_i32_1 = arith.constant 0 : i32
    return %c0_i32, %c0_i32_0 : i32, i32
  }
  func.func @transform_6(%arg0: i32) -> (i32, i32) {
    %c0_i32 = arith.constant 0 : i32
    %c0_i32_0 = arith.constant 0 : i32
    %c0_i32_1 = arith.constant 0 : i32
    return %c0_i32, %c0_i32_0 : i32, i32
  }
  func.func @transform_7(%arg0: i32) -> (i32, i32) {
    %c0_i32 = arith.constant 0 : i32
    %c0_i32_0 = arith.constant 0 : i32
    return %arg0, %c0_i32 : i32, i32
  }
}

</mosaic_0001>

<bundles_post_ra>
// kernel: tpu_custom_call.1
= control target key start
LH: loop header
LB: loop body
LE: loop exit
PB: predicated region body
PF: predicated region fallthrough
CT: control target
= control target key end

     0   :  { %12 = vsyncpa [#allocation3], 0  ;;  %s849_s0 = inlined_call_operand.hbm [shape: f32[8,32], index: 0, kind: input, shape index: {}]   ;;  %s850_s1 = inlined_call_operand.vmem [shape: bf16[32,128], index: 1, kind: input, shape index: {}]   ;;  %s851_s2 = inlined_call_operand.hbm [shape: f32[1,128], index: 2, kind: input, shape index: {}]   ;;  %s852_s3 = inlined_call_operand.vmem [shape: bf16[128,256], index: 3, kind: input, shape index: {}]   ;;  %s853_s4 = inlined_call_operand.vmem [shape: f32[1,256], index: 4, kind: input, shape index: {}]   ;;  %s854_s5 = inlined_call_operand.vmem [shape: bf16[256,16], index: 5, kind: input, shape index: {}]   ;;  %s855_s6 = inlined_call_operand.vmem [shape: f32[1,16], index: 6, kind: input, shape index: {}]   ;;  %s856_s7 = inlined_call_operand.hbm [shape: f32[8,16], index: 7, kind: output, shape index: {}]  }
   0x1   :  { %13 = vsyncpa [#allocation6], 0 }
   0x2   :  { %14 = vsyncpa [#allocation4], 0  ;;  %s659_s24 = smov [#allocation2]   ;;  %s660_s26 = smov [#allocation5]  }
   0x3   :  { %s21_s25 = sshll.u32 %s659_s24, 4  ;;  %s33_s27 = sshll.u32 %s660_s26, 4  ;;  %s22_s25 = int_to_ptr.vmem [resolvable:$true] %s21_s25  ;;  %s34_s27 = int_to_ptr.vmem [resolvable:$true] %s33_s27 }
   0x4   :  { %s587_s30 = scalar_lea.hbm %s849_s0, 128 }
   0x5   :  { %p588_p0 = scmp.ne.s32.totalorder %s849_s0, %s587_s30  ;;  %p591_p1 = scmp.lt.u32.totalorder %s587_s30, %s849_s0 }
   0x7   :  { %p593_p2 = pnand %p591_p1, %p588_p0 }
   0x9   :  { %596 = shalt.err (!%p593_p2)
}
   0xa   :  { %s597_s12 = scalar_lea.vmem %s22_s25, 128  ;;  %p602_p4 = scmp.lt.s32.totalorder %s22_s25, %s22_s25 }
   0xb   :  { %p598_p3 = scmp.ne.s32.totalorder %s22_s25, %s597_s12  ;;  %p603_p5 = scmp.lt.s32.totalorder %s597_s12, %s597_s12 }
   0xd   :  { %p604_p6 = por %p603_p5, %p602_p4 }
   0xf   :  { %p605_p7 = pnand %p604_p6, %p598_p3 }
  0x11   :  { %608 = shalt.err (!%p605_p7)
}
  0x12   :  { %24 = dma.hbm_to_vmem [thread:$0]  %s849_s0, 128, %s22_s25, [#allocation3]  }
  0x13   :  { %s609_s17 = scalar_lea.hbm %s851_s2, 16 }
  0x14   :  { %p610_p8 = scmp.ne.s32.totalorder %s851_s2, %s609_s17  ;;  %p613_p9 = scmp.lt.u32.totalorder %s609_s17, %s851_s2 }
  0x16   :  { %p615_p10 = pnand %p613_p9, %p610_p8 }
  0x18   :  { %618 = shalt.err (!%p615_p10)
}
  0x19   :  { %s619_s22 = scalar_lea.vmem %s34_s27, 16  ;;  %s623_s23 = scalar_lea.vmem %s34_s27, 32 }
  0x1a   :  { %p620_p11 = scmp.ne.s32.totalorder %s34_s27, %s619_s22  ;;  %p624_p12 = scmp.lt.s32.totalorder %s34_s27, %s34_s27 }
  0x1b   :  { %p625_p13 = scmp.lt.s32.totalorder %s623_s23, %s619_s22 }
  0x1d   :  { %p626_p0 = por %p625_p13, %p624_p12 }
  0x1f   :  { %p627_p1 = pnand %p626_p0, %p620_p11 }
  0x21   :  { %630 = shalt.err (!%p627_p1)
}
  0x22   :  { %36 = dma.hbm_to_vmem [thread:$0]  %s851_s2, 16, %s34_s27, [#allocation6]  }
  0x23   :  { %653 = dma.done.wait [#allocation3], 128  }
  0x24   :  { %654 = vsyncadd [#allocation3], 4294967168 }
  0x25   :  { %655 = dma.done.wait [#allocation6], 16  }
  0x26   :  { %656 = vsyncadd [#allocation6], 4294967280  ;;  %v661_v0 = vmov 0.0   ;;  %vm662_vm0 = vmmov 0   ;;  %v545_v1 = vld [vmem:[%s850_s1] sm:$0xff]   ;;  %v546_v2 = vld [vmem:[%s850_s1 + $0x8] sm:$0xff]   ;;  %v141_v46 = vlaneseq }
  0x27   :  { %531 = vmatprep.subr.bf16.mxu0 %v661_v0  ;;  %535 = vmatprep.mubr.msk.bf16.mxu0 %vm662_vm0, %v661_v0  ;;  %v52_v3 = vld [vmem:[#allocation2] sm:$0xff]  ;;  %v550_v6 = vld [vmem:[%s852_s3 + $0x14] ss:$8 sps:$4 sm:$0xff]   ;;  %vm77_vm1 = vcmask 261120   ;;  %v552_v8 = vld [vmem:[%s852_s3 + $0x10] ss:$8 sps:$4 sm:$0xff]  }
  0x28   :  { %532 = vmatpush3.bf16.msra.mxu0 %v545_v1  ;;  %v547_v4 = vld [vmem:[%s852_s3 + $0x4] ss:$8 sps:$4 sm:$0xff]   ;;  %v549_v5 = vld [vmem:[%s852_s3] ss:$8 sps:$4 sm:$0xff]   ;;  %v53_v7 = vpack.c.bf16 %v52_v3, %v52_v3  ;;  %v556_v11 = vld [vmem:[%s852_s3 + $0x34] ss:$8 sps:$4 sm:$0xff]  }
  0x29   :  { %533 = vmatprep.subr.bf16.mxu0 %v661_v0  ;;  %231 = vmatprep.subr.bf16.mxu1 %v547_v4  ;;  %v553_v9 = vld [vmem:[%s852_s3 + $0x24] ss:$8 sps:$4 sm:$0xff]   ;;  %v555_v10 = vld [vmem:[%s852_s3 + $0x20] ss:$8 sps:$4 sm:$0xff]   ;;  %v558_v12 = vld [vmem:[%s852_s3 + $0x30] ss:$8 sps:$4 sm:$0xff]  }
  0x2a   :  { %232 = vmatpush1.bf16.msra.mxu1 %v549_v5  ;;  %v559_v13 = vld [vmem:[%s852_s3 + $0x44] ss:$8 sps:$4 sm:$0xff]   ;;  %v561_v14 = vld [vmem:[%s852_s3 + $0x40] ss:$8 sps:$4 sm:$0xff]   ;;  %v562_v15 = vld [vmem:[%s852_s3 + $0x54] ss:$8 sps:$4 sm:$0xff]  }
  0x2b   :  { %233 = vmatprep.subr.bf16.mxu1 %v550_v6  ;;  %v564_v16 = vld [vmem:[%s852_s3 + $0x50] ss:$8 sps:$4 sm:$0xff]   ;;  %v565_v17 = vld [vmem:[%s852_s3 + $0x64] ss:$8 sps:$4 sm:$0xff]   ;;  %v567_v18 = vld [vmem:[%s852_s3 + $0x60] ss:$8 sps:$4 sm:$0xff]  }
  0x2c   :  { %534 = vmatpush3.bf16.msra.mxu0 %v546_v2  ;;  %v568_v19 = vld [vmem:[%s852_s3 + $0x74] ss:$8 sps:$4 sm:$0xff]   ;;  %v570_v20 = vld [vmem:[%s852_s3 + $0x70] ss:$8 sps:$4 sm:$0xff]   ;;  %v663_v21 = vmov 0   ;;  %v571_v22 = vld [vmem:[%s854_s5 + $0x40] sm:$0xff]  }
  0x2d   :  { %263 = vmatprep.mubr.bf16.mxu1 %v663_v21  ;;  %v572_v23 = vld [vmem:[%s854_s5] sm:$0xff]   ;;  %v573_v24 = vld [vmem:[%s854_s5 + $0x48] sm:$0xff]   ;;  %509 = vmatprep.subr.bf16.mxu0 %v571_v22  ;;  %v575_v26 = vld [vmem:[%s854_s5 + $0x50] sm:$0xff]   ;;  %v142_v47 = vshrl.u32 %v141_v46, 7  ;;  %vm451_vm2 = vcmask 130048  }
  0x2e   :  { %234 = vmatpush1.bf16.msra.mxu1 %v552_v8  ;;  %v574_v25 = vld [vmem:[%s854_s5 + $0x8] sm:$0xff]   ;;  %v576_v27 = vld [vmem:[%s854_s5 + $0x10] sm:$0xff]   ;;  %v577_v28 = vld [vmem:[%s854_s5 + $0x58] sm:$0xff]  }
  0x2f   :  { %536 = vmatmul.mubr.msk.bf16.vlgmr.msra.gmra.mrb[0].mxu0 %vm77_vm1, %v53_v7  ;;  %235 = vmatprep.subr.bf16.mxu1 %v553_v9  ;;  %v578_v29 = vld [vmem:[%s854_s5 + $0x18] sm:$0xff]   ;;  %v579_v30 = vld [vmem:[%s854_s5 + $0x60] sm:$0xff]   ;;  %v581_v32 = vld [vmem:[%s854_s5 + $0x68] sm:$0xff]   ;;  %v143_v48 = vsub.s32 0, %v142_v47  ;;  %v147_v50 = vsub.s32 1, %v142_v47 }
  0x30   :  { %510 = vmatpush3.bf16.msra.mxu0 %v572_v23  ;;  %v580_v31 = vld [vmem:[%s854_s5 + $0x20] sm:$0xff]   ;;  %v582_v33 = vld [vmem:[%s854_s5 + $0x28] sm:$0xff]   ;;  %v583_v42 = vld [vmem:[%s854_s5 + $0x70] sm:$0xff]  }
  0x31   :  { %511 = vmatprep.subr.bf16.mxu0 %v573_v24  ;;  %v469_v34 = vld [vmem:[#allocation5] ss:$0 sm:$0xff]  ;;  %v584_v43 = vld [vmem:[%s854_s5 + $0x30] sm:$0xff]   ;;  %v585_v44 = vld [vmem:[%s854_s5 + $0x78] sm:$0xff]  }
  0x32   :  { %236 = vmatpush1.bf16.msra.mxu1 %v555_v10  ;;  %v586_v45 = vld [vmem:[%s854_s5 + $0x38] sm:$0xff]   ;;  %v139_v49 = vld [vmem:[%s853_s4] sm:$0x3]  ;;  %s664_s4 = smov [#allocation7]  }
  0x33   :  { %237 = vmatprep.subr.bf16.mxu1 %v556_v11  ;;  %v144_v51 = vrot.slane %v139_v49, %v143_v48  ;;  %v148_v52 = vrot.slane %v139_v49, %v147_v50  ;;  %v489_v0 = vld [vmem:[%s855_s6] ss:$0 sm:$0xff]  ;;  %s459_s17 = sshll.u32 %s664_s4, 4  ;;  %s460_s17 = int_to_ptr.vmem [resolvable:$true] %s459_s17 }
  0x34   :  { %512 = vmatpush3.bf16.msra.mxu0 %v574_v25  ;;  %s631_s18 = scalar_lea.vmem %s460_s17, 128  ;;  %p636_p3 = scmp.lt.s32.totalorder %s460_s17, %s460_s17 }
  0x35   :  { %513 = vmatprep.subr.bf16.mxu0 %v575_v26  ;;  %p632_p2 = scmp.ne.s32.totalorder %s460_s17, %s631_s18  ;;  %p637_p4 = scmp.lt.s32.totalorder %s631_s18, %s631_s18 }
  0x36   :  { %238 = vmatpush1.bf16.msra.mxu1 %v558_v12 }
  0x37   :  { %239 = vmatprep.subr.bf16.mxu1 %v559_v13  ;;  %p638_p5 = por %p637_p4, %p636_p3 }
  0x38   :  { %514 = vmatpush3.bf16.msra.mxu0 %v576_v27 }
  0x39   :  { %515 = vmatprep.subr.bf16.mxu0 %v577_v28  ;;  %p639_p6 = pnand %p638_p5, %p632_p2 }
  0x3a   :  { %240 = vmatpush1.bf16.msra.mxu1 %v561_v14 }
  0x3b   :  { %241 = vmatprep.subr.bf16.mxu1 %v562_v15 }
  0x3c   :  { %516 = vmatpush3.bf16.msra.mxu0 %v578_v29 }
  0x3d   :  { %517 = vmatprep.subr.bf16.mxu0 %v579_v30 }
  0x3e   :  { %242 = vmatpush1.bf16.msra.mxu1 %v564_v16 }
  0x3f   :  { %243 = vmatprep.subr.bf16.mxu1 %v565_v17 }
  0x40   :  { %518 = vmatpush3.bf16.msra.mxu0 %v580_v31 }
  0x41   :  { %519 = vmatprep.subr.bf16.mxu0 %v581_v32 }
  0x42   :  { %244 = vmatpush1.bf16.msra.mxu1 %v567_v18 }
  0x43   :  { %245 = vmatprep.subr.bf16.mxu1 %v568_v19 }
  0x44   :  { %520 = vmatpush3.bf16.msra.mxu0 %v582_v33 }
  0x45   :  { %521 = vmatprep.subr.bf16.mxu0 %v583_v42 }
  0x46   :  { %246 = vmatpush1.bf16.msra.mxu1 %v570_v20 }
  0x48   :  { %522 = vmatpush3.bf16.msra.mxu0 %v584_v43 }
  0x49   :  { %523 = vmatprep.subr.bf16.mxu0 %v585_v44 }
  0x4c   :  { %524 = vmatpush3.bf16.msra.mxu0 %v586_v45 }
 0x102   :  { %v115_v35 = vpop.f32.mrb[0].mxu0 }
 0x103   :  { %v116_v36 = vadd.f32 %v469_v34, %v115_v35  ;;  %v537_v37 = vpop.f32.mrb[1].mxu0 }
 0x104   :  { %v118_v38 = vpop.f32.mrb[2].mxu0 }
 0x105   :  { %v121_v39 = vmax.f32 %v116_v36, 0.0  ;;  %v538_v40 = vpop.f32.mrb[3].mxu0 }
 0x107   :  { %v122_v41 = vpack.c.bf16 %v121_v39, %v121_v39 }
 0x109   :  { %264 = vmatmul.mubr.bf16.vlgmr.msra.gmra.mrb[0].mxu1 %v122_v41 }
 0x1dc   :  { %v265_v53 = vpop.f32.mrb[0].mxu1 }
 0x1dd   :  { %v266_v54 = vadd.f32 %v265_v53, %v144_v51  ;;  %v267_v55 = vpop.f32.mrb[1].mxu1 }
 0x1de   :  { %v268_v56 = vadd.f32 %v267_v55, %v148_v52  ;;  %v269_v57 = vpop.f32.mrb[2].mxu1 }
 0x1df   :  { %v272_v58 = vmax.f32 %v266_v54, 0.0  ;;  %v270_v59 = vpop.f32.mrb[3].mxu1 }
 0x1e0   :  { %v273_v60 = vmax.f32 %v268_v56, 0.0 }
 0x1e1   :  { %v274_v62 = vpack.c.bf16 %v272_v58, %v272_v58 }
 0x1e2   :  { %v275_v61 = vpack.c.bf16 %v273_v60, %v273_v60 }
 0x1e4   :  { %443 = vmatprep.mubr.bf16.mxu0 %v275_v61 }
 0x1e5   :  { %444 = vmatmul.mubr.bf16.vlgmr.msra.gmra.mrb[4].mxu0 %v274_v62 }
 0x2b8   :  { %v525_v63 = vpop.f32.mrb[4].mxu0 }
 0x2b9   :  { %v526_v1 = vpop.f32.mrb[5].mxu0 }
 0x2ba   :  { %v527_v2 = vadd.f32 %v526_v1, %v525_v63  ;;  %v528_v3 = vpop.f32.mrb[6].mxu0 }
 0x2bb   :  { %v529_v4 = vpop.f32.mrb[7].mxu0 }
 0x2bc   :  { %v446_v5 = vadd.f32 %v527_v2, %v489_v0 }
 0x2be   :  { %452 = vst.msk [vmem:[#allocation7] sm:$0xff] %vm451_vm2, %v446_v5 }
 0x2bf   :  { %642 = shalt.err (!%p639_p6)
}
 0x2c0   :  { %s643_s6 = scalar_lea.hbm %s856_s7, 128 }
 0x2c1   :  { %p644_p7 = scmp.ne.s32.totalorder %s856_s7, %s643_s6  ;;  %p647_p8 = scmp.lt.u32.totalorder %s643_s6, %s856_s7 }
 0x2c3   :  { %p649_p9 = pnand %p647_p8, %p644_p7 }
 0x2c5   :  { %652 = shalt.err (!%p649_p9)
}
 0x2c6   :  { %462 = dma.vmem_to_hbm [thread:$0]  %s460_s17, 128, %s856_s7, [#allocation4]  }
 0x2c7   :  { %657 = dma.done.wait [#allocation4], 128  }
 0x2c8   :  { %658 = vsyncadd [#allocation4], 4294967168 }
 0x2c9   :  { %466 = vsyncpa [#allocation3], 1 }
 0x2ca   :  { %467 = vsyncpa [#allocation6], 1 }
 0x2cb   :  { %468 = vsyncpa [#allocation4], 1 }

// kernel: tpu_custom_call.1
= control target key start
LH: loop header
LB: loop body
LE: loop exit
PB: predicated region body
PF: predicated region fallthrough
CT: control target
= control target key end

     0   :  { %12 = vsyncpa [#allocation3], 0  ;;  %s849_s0 = inlined_call_operand.hbm [shape: f32[8,32], index: 0, kind: input, shape index: {}]   ;;  %s850_s1 = inlined_call_operand.vmem [shape: bf16[32,128], index: 1, kind: input, shape index: {}]   ;;  %s851_s2 = inlined_call_operand.hbm [shape: f32[1,128], index: 2, kind: input, shape index: {}]   ;;  %s852_s3 = inlined_call_operand.vmem [shape: bf16[128,256], index: 3, kind: input, shape index: {}]   ;;  %s853_s4 = inlined_call_operand.vmem [shape: f32[1,256], index: 4, kind: input, shape index: {}]   ;;  %s854_s5 = inlined_call_operand.vmem [shape: bf16[256,16], index: 5, kind: input, shape index: {}]   ;;  %s855_s6 = inlined_call_operand.vmem [shape: f32[1,16], index: 6, kind: input, shape index: {}]   ;;  %s856_s7 = inlined_call_operand.hbm [shape: f32[8,16], index: 7, kind: output, shape index: {}]  }
   0x1   :  { %13 = vsyncpa [#allocation6], 0 }
   0x2   :  { %14 = vsyncpa [#allocation4], 0  ;;  %s659_s24 = smov [#allocation2]   ;;  %s660_s26 = smov [#allocation5]  }
   0x3   :  { %s21_s25 = sshll.u32 %s659_s24, 4  ;;  %s33_s27 = sshll.u32 %s660_s26, 4  ;;  %s22_s25 = int_to_ptr.vmem [resolvable:$true] %s21_s25  ;;  %s34_s27 = int_to_ptr.vmem [resolvable:$true] %s33_s27 }
   0x4   :  { %s587_s30 = scalar_lea.hbm %s849_s0, 128 }
   0x5   :  { %p588_p0 = scmp.ne.s32.totalorder %s849_s0, %s587_s30  ;;  %p591_p1 = scmp.lt.u32.totalorder %s587_s30, %s849_s0 }
   0x7   :  { %p593_p2 = pnand %p591_p1, %p588_p0 }
   0x9   :  { %596 = shalt.err (!%p593_p2)
}
   0xa   :  { %s597_s12 = scalar_lea.vmem %s22_s25, 128  ;;  %p602_p4 = scmp.lt.s32.totalorder %s22_s25, %s22_s25 }
   0xb   :  { %p598_p3 = scmp.ne.s32.totalorder %s22_s25, %s597_s12  ;;  %p603_p5 = scmp.lt.s32.totalorder %s597_s12, %s597_s12 }
   0xd   :  { %p604_p6 = por %p603_p5, %p602_p4 }
   0xf   :  { %p605_p7 = pnand %p604_p6, %p598_p3 }
  0x11   :  { %608 = shalt.err (!%p605_p7)
}
  0x12   :  { %24 = dma.hbm_to_vmem [thread:$0]  %s849_s0, 128, %s22_s25, [#allocation3]  }
  0x13   :  { %s609_s17 = scalar_lea.hbm %s851_s2, 16 }
  0x14   :  { %p610_p8 = scmp.ne.s32.totalorder %s851_s2, %s609_s17  ;;  %p613_p9 = scmp.lt.u32.totalorder %s609_s17, %s851_s2 }
  0x16   :  { %p615_p10 = pnand %p613_p9, %p610_p8 }
  0x18   :  { %618 = shalt.err (!%p615_p10)
}
  0x19   :  { %s619_s22 = scalar_lea.vmem %s34_s27, 16  ;;  %s623_s23 = scalar_lea.vmem %s34_s27, 32 }
  0x1a   :  { %p620_p11 = scmp.ne.s32.totalorder %s34_s27, %s619_s22  ;;  %p624_p12 = scmp.lt.s32.totalorder %s34_s27, %s34_s27 }
  0x1b   :  { %p625_p13 = scmp.lt.s32.totalorder %s623_s23, %s619_s22 }
  0x1d   :  { %p626_p0 = por %p625_p13, %p624_p12 }
  0x1f   :  { %p627_p1 = pnand %p626_p0, %p620_p11 }
  0x21   :  { %630 = shalt.err (!%p627_p1)
}
  0x22   :  { %36 = dma.hbm_to_vmem [thread:$0]  %s851_s2, 16, %s34_s27, [#allocation6]  }
  0x23   :  { %653 = dma.done.wait [#allocation3], 128  }
  0x24   :  { %654 = vsyncadd [#allocation3], 4294967168 }
  0x25   :  { %655 = dma.done.wait [#allocation6], 16  }
  0x26   :  { %656 = vsyncadd [#allocation6], 4294967280  ;;  %v661_v0 = vmov 0.0   ;;  %vm662_vm0 = vmmov 0   ;;  %v545_v1 = vld [vmem:[%s850_s1] sm:$0xff]   ;;  %v546_v2 = vld [vmem:[%s850_s1 + $0x8] sm:$0xff]   ;;  %v141_v46 = vlaneseq }
  0x27   :  { %531 = vmatprep.subr.bf16.mxu0 %v661_v0  ;;  %535 = vmatprep.mubr.msk.bf16.mxu0 %vm662_vm0, %v661_v0  ;;  %v52_v3 = vld [vmem:[#allocation2] sm:$0xff]  ;;  %v550_v6 = vld [vmem:[%s852_s3 + $0x14] ss:$8 sps:$4 sm:$0xff]   ;;  %vm77_vm1 = vcmask 261120   ;;  %v552_v8 = vld [vmem:[%s852_s3 + $0x10] ss:$8 sps:$4 sm:$0xff]  }
  0x28   :  { %532 = vmatpush3.bf16.msra.mxu0 %v545_v1  ;;  %v547_v4 = vld [vmem:[%s852_s3 + $0x4] ss:$8 sps:$4 sm:$0xff]   ;;  %v549_v5 = vld [vmem:[%s852_s3] ss:$8 sps:$4 sm:$0xff]   ;;  %v53_v7 = vpack.c.bf16 %v52_v3, %v52_v3  ;;  %v556_v11 = vld [vmem:[%s852_s3 + $0x34] ss:$8 sps:$4 sm:$0xff]  }
  0x29   :  { %533 = vmatprep.subr.bf16.mxu0 %v661_v0  ;;  %231 = vmatprep.subr.bf16.mxu1 %v547_v4  ;;  %v553_v9 = vld [vmem:[%s852_s3 + $0x24] ss:$8 sps:$4 sm:$0xff]   ;;  %v555_v10 = vld [vmem:[%s852_s3 + $0x20] ss:$8 sps:$4 sm:$0xff]   ;;  %v558_v12 = vld [vmem:[%s852_s3 + $0x30] ss:$8 sps:$4 sm:$0xff]  }
  0x2a   :  { %232 = vmatpush1.bf16.msra.mxu1 %v549_v5  ;;  %v559_v13 = vld [vmem:[%s852_s3 + $0x44] ss:$8 sps:$4 sm:$0xff]   ;;  %v561_v14 = vld [vmem:[%s852_s3 + $0x40] ss:$8 sps:$4 sm:$0xff]   ;;  %v562_v15 = vld [vmem:[%s852_s3 + $0x54] ss:$8 sps:$4 sm:$0xff]  }
  0x2b   :  { %233 = vmatprep.subr.bf16.mxu1 %v550_v6  ;;  %v564_v16 = vld [vmem:[%s852_s3 + $0x50] ss:$8 sps:$4 sm:$0xff]   ;;  %v565_v17 = vld [vmem:[%s852_s3 + $0x64] ss:$8 sps:$4 sm:$0xff]   ;;  %v567_v18 = vld [vmem:[%s852_s3 + $0x60] ss:$8 sps:$4 sm:$0xff]  }
  0x2c   :  { %534 = vmatpush3.bf16.msra.mxu0 %v546_v2  ;;  %v568_v19 = vld [vmem:[%s852_s3 + $0x74] ss:$8 sps:$4 sm:$0xff]   ;;  %v570_v20 = vld [vmem:[%s852_s3 + $0x70] ss:$8 sps:$4 sm:$0xff]   ;;  %v663_v21 = vmov 0   ;;  %v571_v22 = vld [vmem:[%s854_s5 + $0x40] sm:$0xff]  }
  0x2d   :  { %263 = vmatprep.mubr.bf16.mxu1 %v663_v21  ;;  %v572_v23 = vld [vmem:[%s854_s5] sm:$0xff]   ;;  %v573_v24 = vld [vmem:[%s854_s5 + $0x48] sm:$0xff]   ;;  %509 = vmatprep.subr.bf16.mxu0 %v571_v22  ;;  %v575_v26 = vld [vmem:[%s854_s5 + $0x50] sm:$0xff]   ;;  %v142_v47 = vshrl.u32 %v141_v46, 7  ;;  %vm451_vm2 = vcmask 130048  }
  0x2e   :  { %234 = vmatpush1.bf16.msra.mxu1 %v552_v8  ;;  %v574_v25 = vld [vmem:[%s854_s5 + $0x8] sm:$0xff]   ;;  %v576_v27 = vld [vmem:[%s854_s5 + $0x10] sm:$0xff]   ;;  %v577_v28 = vld [vmem:[%s854_s5 + $0x58] sm:$0xff]  }
  0x2f   :  { %536 = vmatmul.mubr.msk.bf16.vlgmr.msra.gmra.mrb[0].mxu0 %vm77_vm1, %v53_v7  ;;  %235 = vmatprep.subr.bf16.mxu1 %v553_v9  ;;  %v578_v29 = vld [vmem:[%s854_s5 + $0x18] sm:$0xff]   ;;  %v579_v30 = vld [vmem:[%s854_s5 + $0x60] sm:$0xff]   ;;  %v581_v32 = vld [vmem:[%s854_s5 + $0x68] sm:$0xff]   ;;  %v143_v48 = vsub.s32 0, %v142_v47  ;;  %v147_v50 = vsub.s32 1, %v142_v47 }
  0x30   :  { %510 = vmatpush3.bf16.msra.mxu0 %v572_v23  ;;  %v580_v31 = vld [vmem:[%s854_s5 + $0x20] sm:$0xff]   ;;  %v582_v33 = vld [vmem:[%s854_s5 + $0x28] sm:$0xff]   ;;  %v583_v42 = vld [vmem:[%s854_s5 + $0x70] sm:$0xff]  }
  0x31   :  { %511 = vmatprep.subr.bf16.mxu0 %v573_v24  ;;  %v469_v34 = vld [vmem:[#allocation5] ss:$0 sm:$0xff]  ;;  %v584_v43 = vld [vmem:[%s854_s5 + $0x30] sm:$0xff]   ;;  %v585_v44 = vld [vmem:[%s854_s5 + $0x78] sm:$0xff]  }
  0x32   :  { %236 = vmatpush1.bf16.msra.mxu1 %v555_v10  ;;  %v586_v45 = vld [vmem:[%s854_s5 + $0x38] sm:$0xff]   ;;  %v139_v49 = vld [vmem:[%s853_s4] sm:$0x3]  ;;  %s664_s4 = smov [#allocation7]  }
  0x33   :  { %237 = vmatprep.subr.bf16.mxu1 %v556_v11  ;;  %v144_v51 = vrot.slane %v139_v49, %v143_v48  ;;  %v148_v52 = vrot.slane %v139_v49, %v147_v50  ;;  %v489_v0 = vld [vmem:[%s855_s6] ss:$0 sm:$0xff]  ;;  %s459_s17 = sshll.u32 %s664_s4, 4  ;;  %s460_s17 = int_to_ptr.vmem [resolvable:$true] %s459_s17 }
  0x34   :  { %512 = vmatpush3.bf16.msra.mxu0 %v574_v25  ;;  %s631_s18 = scalar_lea.vmem %s460_s17, 128  ;;  %p636_p3 = scmp.lt.s32.totalorder %s460_s17, %s460_s17 }
  0x35   :  { %513 = vmatprep.subr.bf16.mxu0 %v575_v26  ;;  %p632_p2 = scmp.ne.s32.totalorder %s460_s17, %s631_s18  ;;  %p637_p4 = scmp.lt.s32.totalorder %s631_s18, %s631_s18 }
  0x36   :  { %238 = vmatpush1.bf16.msra.mxu1 %v558_v12 }
  0x37   :  { %239 = vmatprep.subr.bf16.mxu1 %v559_v13  ;;  %p638_p5 = por %p637_p4, %p636_p3 }
  0x38   :  { %514 = vmatpush3.bf16.msra.mxu0 %v576_v27 }
  0x39   :  { %515 = vmatprep.subr.bf16.mxu0 %v577_v28  ;;  %p639_p6 = pnand %p638_p5, %p632_p2 }
  0x3a   :  { %240 = vmatpush1.bf16.msra.mxu1 %v561_v14 }
  0x3b   :  { %241 = vmatprep.subr.bf16.mxu1 %v562_v15 }
  0x3c   :  { %516 = vmatpush3.bf16.msra.mxu0 %v578_v29 }
  0x3d   :  { %517 = vmatprep.subr.bf16.mxu0 %v579_v30 }
  0x3e   :  { %242 = vmatpush1.bf16.msra.mxu1 %v564_v16 }
  0x3f   :  { %243 = vmatprep.subr.bf16.mxu1 %v565_v17 }
  0x40   :  { %518 = vmatpush3.bf16.msra.mxu0 %v580_v31 }
  0x41   :  { %519 = vmatprep.subr.bf16.mxu0 %v581_v32 }
  0x42   :  { %244 = vmatpush1.bf16.msra.mxu1 %v567_v18 }
  0x43   :  { %245 = vmatprep.subr.bf16.mxu1 %v568_v19 }
  0x44   :  { %520 = vmatpush3.bf16.msra.mxu0 %v582_v33 }
  0x45   :  { %521 = vmatprep.subr.bf16.mxu0 %v583_v42 }
  0x46   :  { %246 = vmatpush1.bf16.msra.mxu1 %v570_v20 }
  0x48   :  { %522 = vmatpush3.bf16.msra.mxu0 %v584_v43 }
  0x49   :  { %523 = vmatprep.subr.bf16.mxu0 %v585_v44 }
  0x4c   :  { %524 = vmatpush3.bf16.msra.mxu0 %v586_v45 }
 0x102   :  { %v115_v35 = vpop.f32.mrb[0].mxu0 }
 0x103   :  { %v116_v36 = vadd.f32 %v469_v34, %v115_v35  ;;  %v537_v37 = vpop.f32.mrb[1].mxu0 }
 0x104   :  { %v118_v38 = vpop.f32.mrb[2].mxu0 }
 0x105   :  { %v121_v39 = vmax.f32 %v116_v36, 0.0  ;;  %v538_v40 = vpop.f32.mrb[3].mxu0 }
 0x107   :  { %v122_v41 = vpack.c.bf16 %v121_v39, %v121_v39 }
 0x109   :  { %264 = vmatmul.mubr.bf16.vlgmr.msra.gmra.mrb[0].mxu1 %v122_v41 }
 0x1dc   :  { %v265_v53 = vpop.f32.mrb[0].mxu1 }
 0x1dd   :  { %v266_v54 = vadd.f32 %v265_v53, %v144_v51  ;;  %v267_v55 = vpop.f32.mrb[1].mxu1 }
 0x1de   :  { %v268_v56 = vadd.f32 %v267_v55, %v148_v52  ;;  %v269_v57 = vpop.f32.mrb[2].mxu1 }
 0x1df   :  { %v272_v58 = vmax.f32 %v266_v54, 0.0  ;;  %v270_v59 = vpop.f32.mrb[3].mxu1 }
 0x1e0   :  { %v273_v60 = vmax.f32 %v268_v56, 0.0 }
 0x1e1   :  { %v274_v62 = vpack.c.bf16 %v272_v58, %v272_v58 }
 0x1e2   :  { %v275_v61 = vpack.c.bf16 %v273_v60, %v273_v60 }
 0x1e4   :  { %443 = vmatprep.mubr.bf16.mxu0 %v275_v61 }
 0x1e5   :  { %444 = vmatmul.mubr.bf16.vlgmr.msra.gmra.mrb[4].mxu0 %v274_v62 }
 0x2b8   :  { %v525_v63 = vpop.f32.mrb[4].mxu0 }
 0x2b9   :  { %v526_v1 = vpop.f32.mrb[5].mxu0 }
 0x2ba   :  { %v527_v2 = vadd.f32 %v526_v1, %v525_v63  ;;  %v528_v3 = vpop.f32.mrb[6].mxu0 }
 0x2bb   :  { %v529_v4 = vpop.f32.mrb[7].mxu0 }
 0x2bc   :  { %v446_v5 = vadd.f32 %v527_v2, %v489_v0 }
 0x2be   :  { %452 = vst.msk [vmem:[#allocation7] sm:$0xff] %vm451_vm2, %v446_v5 }
 0x2bf   :  { %642 = shalt.err (!%p639_p6)
}
 0x2c0   :  { %s643_s6 = scalar_lea.hbm %s856_s7, 128 }
 0x2c1   :  { %p644_p7 = scmp.ne.s32.totalorder %s856_s7, %s643_s6  ;;  %p647_p8 = scmp.lt.u32.totalorder %s643_s6, %s856_s7 }
 0x2c3   :  { %p649_p9 = pnand %p647_p8, %p644_p7 }
 0x2c5   :  { %652 = shalt.err (!%p649_p9)
}
 0x2c6   :  { %462 = dma.vmem_to_hbm [thread:$0]  %s460_s17, 128, %s856_s7, [#allocation4]  }
 0x2c7   :  { %657 = dma.done.wait [#allocation4], 128  }
 0x2c8   :  { %658 = vsyncadd [#allocation4], 4294967168 }
 0x2c9   :  { %466 = vsyncpa [#allocation3], 1 }
 0x2ca   :  { %467 = vsyncpa [#allocation6], 1 }
 0x2cb   :  { %468 = vsyncpa [#allocation4], 1 }

</bundles_post_ra>
